<compile_context>
chip_gen: v7x
topology: tpu7x:2x2x1
jax: 0.10.0
libtpu: 0.0.40
codegen_flags: <defaults>
</compile_context>

<pallas_src>
import functools

import jax
import jax.numpy as jnp
from jax import lax
from jax.experimental import pallas as pl
from jax.experimental.pallas import tpu as pltpu

LN_EPS = 1e-5
_INV_SQRT2 = 0.7071067811865476
_LANE = 128
_SUBLANE = 8

# One-time feature probe result for single-buffered resident weights.
_FEATURES = {"single_buffer_weights": None}


def _round_up(x, m):
    return ((x + m - 1) // m) * m


def _gelu(x, *, tanh_approx=False):
    if tanh_approx:
        # tanh lives in the EUP slot -> frees VALU bundles (big win on v5e); numerics
        # deviate slightly from exact-erf nn.GELU, so it stays opt-in.
        c = 0.7978845608028654  # sqrt(2/pi)
        return 0.5 * x * (1.0 + jnp.tanh(c * (x + 0.044715 * x * x * x)))
    # nn.GELU() default (approximate='none'): 0.5 * x * (1 + erf(x / sqrt(2)))
    return 0.5 * x * (1.0 + lax.erf(x * _INV_SQRT2))


def _projector_kernel(x_ref, w1_ref, affine_ref, w2_ref, o_ref, *,
                      l2norm, hidden_true, tanh_gelu, low_precision_elementwise):
    """One batch tile: (TM, K) -> (TM, N).  Hidden dim is lane-padded to 128."""
    x = x_ref[...]                                   # (TM, K), native dtype

    inv_norm = None
    if l2norm:
        xf = x.astype(jnp.float32)
        # rsqrt on the EUP instead of sqrt + exact divide on the VALU.
        inv_norm = lax.rsqrt(jnp.sum(xf * xf, axis=-1, keepdims=True))
        x = (xf * inv_norm).astype(x_ref.dtype)

    # Linear 1 — operands in native dtype (bf16 hits the MXU at full rate),
    # f32 accumulation.
    h = jnp.dot(x, w1_ref[...], preferred_element_type=jnp.float32)   # (TM, Hp) f32
    h = h + affine_ref[0:1, :].astype(jnp.float32)                    # + b1

    # LayerNorm over the *true* hidden width.  Padded lanes of h are exactly zero
    # (zero-padded w1 columns and b1), so both raw sums are already over the true
    # width; no lane mask needed.  Padded lanes are re-zeroed by gamma/beta pads.
    inv_h = jnp.float32(1.0 / hidden_true)
    mu = jnp.sum(h, axis=-1, keepdims=True) * inv_h
    var = jnp.sum(h * h, axis=-1, keepdims=True) * inv_h - mu * mu
    hn = (h - mu) * lax.rsqrt(var + LN_EPS)          # f32

    # Affine + GELU in bf16 when the second matmul is bf16 anyway (v6e/v7x packed VALU).
    ew_dtype = w2_ref.dtype if low_precision_elementwise else jnp.float32
    hn = hn.astype(ew_dtype)
    gamma = affine_ref[1:2, :].astype(ew_dtype)
    beta = affine_ref[2:3, :].astype(ew_dtype)
    hn = hn * gamma + beta                           # padded lanes stay exactly 0
    g = _gelu(hn, tanh_approx=tanh_gelu)

    # Linear 2 (no bias), f32 accumulation.  Output feature dim is left unpadded
    # (full-dim last block) so the HBM writeback is only the true N columns.
    y = jnp.dot(g.astype(w2_ref.dtype), w2_ref[...],
                preferred_element_type=jnp.float32)  # (TM, N) f32

    if l2norm:
        y = y * inv_norm

    o_ref[...] = y.astype(o_ref.dtype)


def prepare_projector_params(w1, b1, gamma, beta, w2):
    """Pad / pack the weights ONCE (hoisted out of the per-call path).

    w1: (K, H); b1/gamma/beta: (H,) or (1, H); w2: (H, N).
    """
    K, H = w1.shape
    Hw, N = w2.shape
    assert Hw == H, "weight shapes inconsistent"
    Hp = _round_up(H, _LANE)                         # lane-dense hidden dim
    w1p = jnp.pad(w1, ((0, 0), (0, Hp - H)))
    affine = jnp.stack(
        [b1.reshape(H), gamma.reshape(H), beta.reshape(H)], axis=0)   # (3, H)
    affinep = jnp.pad(affine, ((0, 0), (0, Hp - H)))
    w2p = jnp.pad(w2, ((0, Hp - H), (0, 0)))         # only rows padded; N stays true
    return {"w1": w1p, "affine": affinep, "w2": w2p,
            "in": K, "hidden": H, "hidden_padded": Hp, "out": N}


def projector_apply(params, x, *, l2norm=False, tanh_gelu=False,
                    low_precision_elementwise=None, block_b=1024):
    """Apply the projector head.  Output dtype follows x.dtype.

    Notes for chip tuning:
      * v5e: pass tanh_gelu=True (EUP) and low_precision_elementwise=False (no bf16 VALU).
      * v6e/v7x: defaults are fine; bf16 elementwise is auto-enabled for bf16 weights.
    """
    B, K = x.shape
    assert K == params["in"], "input feature size mismatch"
    H, Hp, N = params["hidden"], params["hidden_padded"], params["out"]
    w1p, affinep, w2p = params["w1"], params["affine"], params["w2"]

    if low_precision_elementwise is None:
        low_precision_elementwise = jnp.dtype(w2p.dtype) == jnp.dtype(jnp.bfloat16)

    # Batch tile: dtype-native row multiple (8 f32 / 16 bf16 / 32 int8), big tiles.
    row_mult = max(_SUBLANE, 32 // jnp.dtype(x.dtype).itemsize)
    TM = min(_round_up(block_b, row_mult), _round_up(B, row_mult))
    grid = (pl.cdiv(B, TM),)                         # no wrapper-side batch padding

    # VMEM budget escape hatch (conservative: assume double-buffered weights).
    w_item = jnp.dtype(w1p.dtype).itemsize
    x_item = jnp.dtype(x.dtype).itemsize
    est = ((K * Hp + 3 * Hp + Hp * N) * w_item * 2
           + 2 * TM * (K + N) * x_item
           + 6 * TM * Hp * 4)
    vmem_limit = min(int(est * 1.25), 127 << 20) if est > (32 << 20) else None
    # TODO(synk): if resident weights alone approach v7x's 64 MiB physical VMEM, switch to
    #             an H-tiled reduction grid axis ("arbitrary") with an f32 VMEM accumulator.

    kernel = functools.partial(
        _projector_kernel, l2norm=l2norm, hidden_true=H, tanh_gelu=tanh_gelu,
        low_precision_elementwise=low_precision_elementwise)

    def _invoke(weight_mode):
        wkw = {} if weight_mode is None else {"pipeline_mode": weight_mode}
        return pl.pallas_call(
            kernel,
            out_shape=jax.ShapeDtypeStruct((B, N), x.dtype),
            grid_spec=pltpu.PrefetchScalarGridSpec(
                num_scalar_prefetch=0,
                grid=grid,
                in_specs=[
                    pl.BlockSpec((TM, K), lambda i: (i, 0)),            # streamed batch tile
                    pl.BlockSpec((K, Hp), lambda i: (0, 0), **wkw),     # resident weights
                    pl.BlockSpec((3, Hp), lambda i: (0, 0), **wkw),     # packed b1/gamma/beta
                    pl.BlockSpec((Hp, N), lambda i: (0, 0), **wkw),
                ],
                out_specs=pl.BlockSpec((TM, N), lambda i: (i, 0)),      # true-N output block
            ),
            compiler_params=pltpu.CompilerParams(
                dimension_semantics=("parallel",),   # megacore sharding on v7x
                vmem_limit_bytes=vmem_limit),
        )(x, w1p, affinep, w2p)

    buffered_cls = getattr(pl, "Buffered", None)
    use_single = _FEATURES["single_buffer_weights"]
    if buffered_cls is None:
        use_single = False

    if use_single is True:
        return _invoke(buffered_cls(1))
    if use_single is False:
        return _invoke(None)

    # First (eager) call: probe single-buffered resident weights once and validate
    # against the default pipeline; cache the decision.  Always leaves a working path.
    try:
        out_sb = _invoke(buffered_cls(1))
    except Exception:
        out_sb = None
    out_db = _invoke(None)
    if out_sb is not None and bool(jnp.allclose(out_sb.astype(jnp.float32),
                                                out_db.astype(jnp.float32),
                                                atol=0.0, rtol=0.0)):
        _FEATURES["single_buffer_weights"] = True
        return out_sb
    _FEATURES["single_buffer_weights"] = False
    return out_db


def projector_forward(x, w1, b1, gamma, beta, w2, **kwargs):
    """Convenience wrapper (pads weights per call). Prefer prepare_projector_params()."""
    return projector_apply(prepare_projector_params(w1, b1, gamma, beta, w2), x, **kwargs)


def reference_forward(x, w1, b1, gamma, beta, w2, *, l2norm=False):
    """Pure-JAX f32 reference of the PyTorch forward."""
    x = x.astype(jnp.float32)
    w1 = w1.astype(jnp.float32)
    b1 = b1.reshape(1, -1).astype(jnp.float32)
    gamma = gamma.reshape(1, -1).astype(jnp.float32)
    beta = beta.reshape(1, -1).astype(jnp.float32)
    w2 = w2.astype(jnp.float32)
    if l2norm:
        n = jnp.linalg.norm(x, axis=1, keepdims=True)
        x = x / n
    h = x @ w1 + b1
    mu = h.mean(-1, keepdims=True)
    var = ((h - mu) ** 2).mean(-1, keepdims=True)
    hn = (h - mu) / jnp.sqrt(var + LN_EPS) * gamma + beta
    g = 0.5 * hn * (1.0 + lax.erf(hn * _INV_SQRT2))
    y = g @ w2
    if l2norm:
        y = y / n
    return y


if __name__ == "__main__":
    # Small shapes implied by the module: embedding (B, input_size).
    B, input_size, hidden_size, output_size = 10, 32, 64, 16

    key = jax.random.PRNGKey(0)
    kx, kw1, kb1, kg, kbeta, kw2 = jax.random.split(key, 6)

    x = jax.random.normal(kx, (B, input_size), jnp.float32)
    w1 = jax.random.normal(kw1, (input_size, hidden_size), jnp.float32) * 0.1
    b1 = jax.random.normal(kb1, (1, hidden_size), jnp.float32) * 0.1
    gamma = 1.0 + 0.1 * jax.random.normal(kg, (1, hidden_size), jnp.float32)
    beta = 0.1 * jax.random.normal(kbeta, (1, hidden_size), jnp.float32)
    w2 = jax.random.normal(kw2, (hidden_size, output_size), jnp.float32) * 0.1

    # f32 path: tight check against the exact reference (weights pre-padded once).
    params_f32 = prepare_projector_params(w1, b1, gamma, beta, w2)
    for l2norm in (False, True):
        out = jax.block_until_ready(projector_apply(params_f32, x, l2norm=l2norm))
        ref = reference_forward(x, w1, b1, gamma, beta, w2, l2norm=l2norm)
        assert out.shape == ref.shape, (out.shape, ref.shape)
        err = jnp.max(jnp.abs(out - ref))
        assert jnp.allclose(out, ref, atol=1e-4, rtol=1e-4), (
            f"f32 mismatch (l2norm={l2norm}): {err}")

    # bf16 operands (MXU-native matmuls, bf16 affine/GELU, bf16 writeback): loose tolerance.
    def bf(a):
        return a.astype(jnp.bfloat16)

    params_bf16 = prepare_projector_params(bf(w1), bf(b1), bf(gamma), bf(beta), bf(w2))
    for l2norm in (False, True):
        out = jax.block_until_ready(projector_apply(params_bf16, bf(x), l2norm=l2norm))
        ref = reference_forward(bf(x), bf(w1), bf(b1), bf(gamma), bf(beta), bf(w2),
                                l2norm=l2norm)
        err = jnp.max(jnp.abs(out.astype(jnp.float32) - ref))
        assert jnp.allclose(out.astype(jnp.float32), ref, atol=5e-2, rtol=5e-2), (
            f"bf16 mismatch (l2norm={l2norm}): {err}")

    print("KERNEL_OK")
</pallas_src>

<mosaic_0001>
module attributes {stable_mosaic.version = 11 : i64} {
  func.func @_projector_kernel(%arg0: i32, %arg1: memref<16x32xf32, #tpu.memory_space<vmem>>, %arg2: memref<32x128xf32, #tpu.memory_space<vmem>>, %arg3: memref<3x128xf32, #tpu.memory_space<vmem>>, %arg4: memref<128x16xf32, #tpu.memory_space<vmem>>, %arg5: memref<16x16xf32, #tpu.memory_space<vmem>>) attributes {dimension_semantics = [#tpu.dimension_semantics<parallel>], iteration_bounds = array<i64: 1>, scalar_prefetch = 0 : i64, scratch_operands = 0 : i64, tpu.core_type = #tpu.core_type<tc>, window_params = [{transform_indices = @transform_0, window_bounds = array<i64: 16, 32>}, {pipeline_mode = #tpu.pipeline_mode<synchronous>, transform_indices = @transform_1, window_bounds = array<i64: 32, 128>}, {pipeline_mode = #tpu.pipeline_mode<synchronous>, transform_indices = @transform_2, window_bounds = array<i64: 3, 128>}, {pipeline_mode = #tpu.pipeline_mode<synchronous>, transform_indices = @transform_3, window_bounds = array<i64: 128, 16>}, {transform_indices = @transform_4, window_bounds = array<i64: 16, 16>}]} {
    %c0 = arith.constant 0 : index
    %c0_0 = arith.constant 0 : index
    %0 = vector.load %arg1[%c0, %c0_0] : memref<16x32xf32, #tpu.memory_space<vmem>>, vector<16x32xf32>
    %c0_1 = arith.constant 0 : index
    %c0_2 = arith.constant 0 : index
    %1 = vector.load %arg2[%c0_1, %c0_2] : memref<32x128xf32, #tpu.memory_space<vmem>>, vector<32x128xf32>
    %cst = arith.constant dense<0.000000e+00> : vector<16x128xf32>
    %2 = tpu.matmul %0, %1, %cst {dimension_numbers = #tpu.dot_dimension_numbers<[1], [0], [0], [1], [0, 0, 1, 1], [], []>} : vector<16x32xf32>, vector<32x128xf32>, vector<16x128xf32> -> vector<16x128xf32>
    %c0_3 = arith.constant 0 : index
    %c0_4 = arith.constant 0 : index
    %3 = vector.load %arg3[%c0_3, %c0_4] : memref<3x128xf32, #tpu.memory_space<vmem>>, vector<1x128xf32>
    %4 = vector.broadcast %3 : vector<1x128xf32> to vector<16x128xf32>
    %5 = arith.addf %2, %4 : vector<16x128xf32>
    %cst_5 = arith.constant dense<0.000000e+00> : vector<16xf32>
    %6 = vector.multi_reduction <add>, %5, %cst_5 [1] : vector<16x128xf32> to vector<16xf32>
    %7 = vector.shape_cast %6 : vector<16xf32> to vector<16x1xf32>
    %cst_6 = arith.constant 1.562500e-02 : f32
    %8 = vector.broadcast %cst_6 : f32 to vector<16x1xf32>
    %9 = arith.mulf %7, %8 : vector<16x1xf32>
    %10 = arith.mulf %5, %5 : vector<16x128xf32>
    %cst_7 = arith.constant dense<0.000000e+00> : vector<16xf32>
    %11 = vector.multi_reduction <add>, %10, %cst_7 [1] : vector<16x128xf32> to vector<16xf32>
    %12 = vector.shape_cast %11 : vector<16xf32> to vector<16x1xf32>
    %cst_8 = arith.constant 1.562500e-02 : f32
    %13 = vector.broadcast %cst_8 : f32 to vector<16x1xf32>
    %14 = arith.mulf %12, %13 : vector<16x1xf32>
    %15 = arith.mulf %9, %9 : vector<16x1xf32>
    %16 = arith.subf %14, %15 : vector<16x1xf32>
    %17 = vector.broadcast %9 : vector<16x1xf32> to vector<16x128xf32>
    %18 = arith.subf %5, %17 : vector<16x128xf32>
    %cst_9 = arith.constant 9.99999974E-6 : f32
    %19 = vector.broadcast %cst_9 : f32 to vector<16x1xf32>
    %20 = arith.addf %16, %19 : vector<16x1xf32>
    %21 = math.rsqrt %20 : vector<16x1xf32>
    %22 = vector.broadcast %21 : vector<16x1xf32> to vector<16x128xf32>
    %23 = arith.mulf %18, %22 : vector<16x128xf32>
    %c1 = arith.constant 1 : index
    %c0_10 = arith.constant 0 : index
    %24 = vector.load %arg3[%c1, %c0_10] : memref<3x128xf32, #tpu.memory_space<vmem>>, vector<1x128xf32>
    %c2 = arith.constant 2 : index
    %c0_11 = arith.constant 0 : index
    %25 = vector.load %arg3[%c2, %c0_11] : memref<3x128xf32, #tpu.memory_space<vmem>>, vector<1x128xf32>
    %26 = vector.broadcast %24 : vector<1x128xf32> to vector<16x128xf32>
    %27 = arith.mulf %23, %26 : vector<16x128xf32>
    %28 = vector.broadcast %25 : vector<1x128xf32> to vector<16x128xf32>
    %29 = arith.addf %27, %28 : vector<16x128xf32>
    %cst_12 = arith.constant 5.000000e-01 : f32
    %30 = vector.broadcast %cst_12 : f32 to vector<16x128xf32>
    %31 = arith.mulf %30, %29 : vector<16x128xf32>
    %cst_13 = arith.constant 0.707106769 : f32
    %32 = vector.broadcast %cst_13 : f32 to vector<16x128xf32>
    %33 = arith.mulf %29, %32 : vector<16x128xf32>
    %34 = math.erf %33 : vector<16x128xf32>
    %cst_14 = arith.constant 1.000000e+00 : f32
    %35 = vector.broadcast %cst_14 : f32 to vector<16x128xf32>
    %36 = arith.addf %35, %34 : vector<16x128xf32>
    %37 = arith.mulf %31, %36 : vector<16x128xf32>
    %c0_15 = arith.constant 0 : index
    %c0_16 = arith.constant 0 : index
    %38 = vector.load %arg4[%c0_15, %c0_16] : memref<128x16xf32, #tpu.memory_space<vmem>>, vector<128x16xf32>
    %cst_17 = arith.constant dense<0.000000e+00> : vector<16x16xf32>
    %39 = tpu.matmul %37, %38, %cst_17 {dimension_numbers = #tpu.dot_dimension_numbers<[1], [0], [0], [1], [0, 0, 1, 1], [], []>} : vector<16x128xf32>, vector<128x16xf32>, vector<16x16xf32> -> vector<16x16xf32>
    %c0_18 = arith.constant 0 : index
    %c0_19 = arith.constant 0 : index
    %40 = vector.load %arg5[%c0_18, %c0_19] : memref<16x16xf32, #tpu.memory_space<vmem>>, vector<16x16xf32>
    tpu.vector_store %arg5[%c0_18, %c0_19], %39 {strides = array<i32>} : memref<16x16xf32, #tpu.memory_space<vmem>>, vector<16x16xf32>,
    return
  }
  func.func @transform_0(%arg0: i32) -> (i32, i32) {
    %c0_i32 = arith.constant 0 : i32
    %c0_i32_0 = arith.constant 0 : i32
    return %arg0, %c0_i32 : i32, i32
  }
  func.func @transform_1(%arg0: i32) -> (i32, i32) {
    %c0_i32 = arith.constant 0 : i32
    %c0_i32_0 = arith.constant 0 : i32
    %c0_i32_1 = arith.constant 0 : i32
    return %c0_i32, %c0_i32_0 : i32, i32
  }
  func.func @transform_2(%arg0: i32) -> (i32, i32) {
    %c0_i32 = arith.constant 0 : i32
    %c0_i32_0 = arith.constant 0 : i32
    %c0_i32_1 = arith.constant 0 : i32
    return %c0_i32, %c0_i32_0 : i32, i32
  }
  func.func @transform_3(%arg0: i32) -> (i32, i32) {
    %c0_i32 = arith.constant 0 : i32
    %c0_i32_0 = arith.constant 0 : i32
    %c0_i32_1 = arith.constant 0 : i32
    return %c0_i32, %c0_i32_0 : i32, i32
  }
  func.func @transform_4(%arg0: i32) -> (i32, i32) {
    %c0_i32 = arith.constant 0 : i32
    %c0_i32_0 = arith.constant 0 : i32
    return %arg0, %c0_i32 : i32, i32
  }
}

module attributes {stable_mosaic.version = 11 : i64} {
  func.func @_projector_kernel(%arg0: i32, %arg1: memref<16x32xf32, #tpu.memory_space<vmem>>, %arg2: memref<32x128xf32, #tpu.memory_space<vmem>>, %arg3: memref<3x128xf32, #tpu.memory_space<vmem>>, %arg4: memref<128x16xf32, #tpu.memory_space<vmem>>, %arg5: memref<16x16xf32, #tpu.memory_space<vmem>>) attributes {dimension_semantics = [#tpu.dimension_semantics<parallel>], iteration_bounds = array<i64: 1>, scalar_prefetch = 0 : i64, scratch_operands = 0 : i64, tpu.core_type = #tpu.core_type<tc>, window_params = [{transform_indices = @transform_0, window_bounds = array<i64: 16, 32>}, {pipeline_mode = #tpu.pipeline_mode<synchronous>, transform_indices = @transform_1, window_bounds = array<i64: 32, 128>}, {pipeline_mode = #tpu.pipeline_mode<synchronous>, transform_indices = @transform_2, window_bounds = array<i64: 3, 128>}, {pipeline_mode = #tpu.pipeline_mode<synchronous>, transform_indices = @transform_3, window_bounds = array<i64: 128, 16>}, {transform_indices = @transform_4, window_bounds = array<i64: 16, 16>}]} {
    %c0 = arith.constant 0 : index
    %c0_0 = arith.constant 0 : index
    %0 = vector.load %arg1[%c0, %c0_0] : memref<16x32xf32, #tpu.memory_space<vmem>>, vector<16x32xf32>
    %c0_1 = arith.constant 0 : index
    %c0_2 = arith.constant 0 : index
    %1 = vector.load %arg2[%c0_1, %c0_2] : memref<32x128xf32, #tpu.memory_space<vmem>>, vector<32x128xf32>
    %cst = arith.constant dense<0.000000e+00> : vector<16x128xf32>
    %2 = tpu.matmul %0, %1, %cst {dimension_numbers = #tpu.dot_dimension_numbers<[1], [0], [0], [1], [0, 0, 1, 1], [], []>} : vector<16x32xf32>, vector<32x128xf32>, vector<16x128xf32> -> vector<16x128xf32>
    %c0_3 = arith.constant 0 : index
    %c0_4 = arith.constant 0 : index
    %3 = vector.load %arg3[%c0_3, %c0_4] : memref<3x128xf32, #tpu.memory_space<vmem>>, vector<1x128xf32>
    %4 = vector.broadcast %3 : vector<1x128xf32> to vector<16x128xf32>
    %5 = arith.addf %2, %4 : vector<16x128xf32>
    %cst_5 = arith.constant dense<0.000000e+00> : vector<16xf32>
    %6 = vector.multi_reduction <add>, %5, %cst_5 [1] : vector<16x128xf32> to vector<16xf32>
    %7 = vector.shape_cast %6 : vector<16xf32> to vector<16x1xf32>
    %cst_6 = arith.constant 1.562500e-02 : f32
    %8 = vector.broadcast %cst_6 : f32 to vector<16x1xf32>
    %9 = arith.mulf %7, %8 : vector<16x1xf32>
    %10 = arith.mulf %5, %5 : vector<16x128xf32>
    %cst_7 = arith.constant dense<0.000000e+00> : vector<16xf32>
    %11 = vector.multi_reduction <add>, %10, %cst_7 [1] : vector<16x128xf32> to vector<16xf32>
    %12 = vector.shape_cast %11 : vector<16xf32> to vector<16x1xf32>
    %cst_8 = arith.constant 1.562500e-02 : f32
    %13 = vector.broadcast %cst_8 : f32 to vector<16x1xf32>
    %14 = arith.mulf %12, %13 : vector<16x1xf32>
    %15 = arith.mulf %9, %9 : vector<16x1xf32>
    %16 = arith.subf %14, %15 : vector<16x1xf32>
    %17 = vector.broadcast %9 : vector<16x1xf32> to vector<16x128xf32>
    %18 = arith.subf %5, %17 : vector<16x128xf32>
    %cst_9 = arith.constant 9.99999974E-6 : f32
    %19 = vector.broadcast %cst_9 : f32 to vector<16x1xf32>
    %20 = arith.addf %16, %19 : vector<16x1xf32>
    %21 = math.rsqrt %20 : vector<16x1xf32>
    %22 = vector.broadcast %21 : vector<16x1xf32> to vector<16x128xf32>
    %23 = arith.mulf %18, %22 : vector<16x128xf32>
    %c1 = arith.constant 1 : index
    %c0_10 = arith.constant 0 : index
    %24 = vector.load %arg3[%c1, %c0_10] : memref<3x128xf32, #tpu.memory_space<vmem>>, vector<1x128xf32>
    %c2 = arith.constant 2 : index
    %c0_11 = arith.constant 0 : index
    %25 = vector.load %arg3[%c2, %c0_11] : memref<3x128xf32, #tpu.memory_space<vmem>>, vector<1x128xf32>
    %26 = vector.broadcast %24 : vector<1x128xf32> to vector<16x128xf32>
    %27 = arith.mulf %23, %26 : vector<16x128xf32>
    %28 = vector.broadcast %25 : vector<1x128xf32> to vector<16x128xf32>
    %29 = arith.addf %27, %28 : vector<16x128xf32>
    %cst_12 = arith.constant 5.000000e-01 : f32
    %30 = vector.broadcast %cst_12 : f32 to vector<16x128xf32>
    %31 = arith.mulf %30, %29 : vector<16x128xf32>
    %cst_13 = arith.constant 0.707106769 : f32
    %32 = vector.broadcast %cst_13 : f32 to vector<16x128xf32>
    %33 = arith.mulf %29, %32 : vector<16x128xf32>
    %34 = math.erf %33 : vector<16x128xf32>
    %cst_14 = arith.constant 1.000000e+00 : f32
    %35 = vector.broadcast %cst_14 : f32 to vector<16x128xf32>
    %36 = arith.addf %35, %34 : vector<16x128xf32>
    %37 = arith.mulf %31, %36 : vector<16x128xf32>
    %c0_15 = arith.constant 0 : index
    %c0_16 = arith.constant 0 : index
    %38 = vector.load %arg4[%c0_15, %c0_16] : memref<128x16xf32, #tpu.memory_space<vmem>>, vector<128x16xf32>
    %cst_17 = arith.constant dense<0.000000e+00> : vector<16x16xf32>
    %39 = tpu.matmul %37, %38, %cst_17 {dimension_numbers = #tpu.dot_dimension_numbers<[1], [0], [0], [1], [0, 0, 1, 1], [], []>} : vector<16x128xf32>, vector<128x16xf32>, vector<16x16xf32> -> vector<16x16xf32>
    %c0_18 = arith.constant 0 : index
    %c0_19 = arith.constant 0 : index
    %40 = vector.load %arg5[%c0_18, %c0_19] : memref<16x16xf32, #tpu.memory_space<vmem>>, vector<16x16xf32>
    tpu.vector_store %arg5[%c0_18, %c0_19], %39 {strides = array<i32>} : memref<16x16xf32, #tpu.memory_space<vmem>>, vector<16x16xf32>,
    return
  }
  func.func @transform_0(%arg0: i32) -> (i32, i32) {
    %c0_i32 = arith.constant 0 : i32
    %c0_i32_0 = arith.constant 0 : i32
    return %arg0, %c0_i32 : i32, i32
  }
  func.func @transform_1(%arg0: i32) -> (i32, i32) {
    %c0_i32 = arith.constant 0 : i32
    %c0_i32_0 = arith.constant 0 : i32
    %c0_i32_1 = arith.constant 0 : i32
    return %c0_i32, %c0_i32_0 : i32, i32
  }
  func.func @transform_2(%arg0: i32) -> (i32, i32) {
    %c0_i32 = arith.constant 0 : i32
    %c0_i32_0 = arith.constant 0 : i32
    %c0_i32_1 = arith.constant 0 : i32
    return %c0_i32, %c0_i32_0 : i32, i32
  }
  func.func @transform_3(%arg0: i32) -> (i32, i32) {
    %c0_i32 = arith.constant 0 : i32
    %c0_i32_0 = arith.constant 0 : i32
    %c0_i32_1 = arith.constant 0 : i32
    return %c0_i32, %c0_i32_0 : i32, i32
  }
  func.func @transform_4(%arg0: i32) -> (i32, i32) {
    %c0_i32 = arith.constant 0 : i32
    %c0_i32_0 = arith.constant 0 : i32
    return %arg0, %c0_i32 : i32, i32
  }
}

</mosaic_0001>

<bundles_post_ra>
// kernel: tpu_custom_call.1
= control target key start
LH: loop header
LB: loop body
LE: loop exit
PB: predicated region body
PF: predicated region fallthrough
CT: control target
= control target key end

     0   :  { %vm29_vm0 = vcmask 261120   ;;  %s548_s0 = inlined_call_operand.vmem [shape: f32[10,32], index: 0, kind: input, shape index: {}]   ;;  %s549_s1 = inlined_call_operand.vmem [shape: f32[32,128], index: 1, kind: input, shape index: {}]   ;;  %s550_s2 = inlined_call_operand.vmem [shape: f32[3,128], index: 2, kind: input, shape index: {}]   ;;  %s551_s3 = inlined_call_operand.vmem [shape: f32[128,16], index: 3, kind: input, shape index: {}]   ;;  %s552_s4 = inlined_call_operand.hbm [shape: f32[10,16], index: 4, kind: output, shape index: {}]  }
   0x1   :  { %v20_v0 = vld [vmem:[%s549_s1] sm:$0xff]  ;;  %v21_v1 = vld [vmem:[%s549_s1 + $0x8] sm:$0xff]  ;;  %v22_v2 = vld [vmem:[%s549_s1 + $0x10] sm:$0xff] }
   0x2   :  { %v346_v3 = vpack.c.bf16 %v21_v1, %v20_v0  ;;  %v23_v4 = vld [vmem:[%s549_s1 + $0x18] sm:$0xff]  ;;  %v18_v5 = vld [vmem:[%s548_s0] sm:$0xff] }
   0x3   :  { %v350_v6 = vpack.c.bf16 %v23_v4, %v22_v2  ;;  %308 = vmatprep.mubr.msk.f32.mxu0 %vm29_vm0, %v18_v5 }
   0x4   :  { %9 = vsyncpa [#allocation3], 0  ;;  %347 = vmatprep.subr.bf16.mxu0 %v346_v3  ;;  %v19_v7 = vld [vmem:[%s548_s0 + $0x8] sm:$0xff]  ;;  %v271_v8 = vld [vmem:[%s550_s2] ss:$0 sm:$0xff]  ;;  %vm252_vm1 = vcmask 130048  }
   0x5   :  { %349 = vmatpush3.bf16.msra.mxu0 %v346_v3  ;;  %v161_v15 = vld [vmem:[%s551_s3] sm:$0xff]  ;;  %v162_v16 = vld [vmem:[%s551_s3 + $0x8] sm:$0xff]  ;;  %v163_v18 = vld [vmem:[%s551_s3 + $0x10] sm:$0xff] }
   0x6   :  { %351 = vmatprep.subr.bf16.mxu0 %v350_v6  ;;  %v354_v17 = vpack.c.bf16 %v162_v16, %v161_v15  ;;  %v164_v19 = vld [vmem:[%s551_s3 + $0x18] sm:$0xff]  ;;  %v165_v21 = vld [vmem:[%s551_s3 + $0x20] sm:$0xff]  ;;  %v166_v22 = vld [vmem:[%s551_s3 + $0x28] sm:$0xff] }
   0x7   :  { %v358_v20 = vpack.c.bf16 %v164_v19, %v163_v18  ;;  %v362_v23 = vpack.c.bf16 %v166_v22, %v165_v21  ;;  %v167_v24 = vld [vmem:[%s551_s3 + $0x30] sm:$0xff]  ;;  %v168_v25 = vld [vmem:[%s551_s3 + $0x38] sm:$0xff]  ;;  %v169_v27 = vld [vmem:[%s551_s3 + $0x40] sm:$0xff] }
   0x8   :  { %355 = vmatprep.subr.bf16.mxu1 %v354_v17  ;;  %v366_v26 = vpack.c.bf16 %v168_v25, %v167_v24  ;;  %v170_v28 = vld [vmem:[%s551_s3 + $0x48] sm:$0xff]  ;;  %v171_v30 = vld [vmem:[%s551_s3 + $0x50] sm:$0xff]  ;;  %v172_v31 = vld [vmem:[%s551_s3 + $0x58] sm:$0xff] }
   0x9   :  { %353 = vmatpush3.bf16.msra.mxu0 %v350_v6  ;;  %357 = vmatpush3.bf16.msra.mxu1 %v354_v17  ;;  %v370_v29 = vpack.c.bf16 %v170_v28, %v169_v27  ;;  %v374_v32 = vpack.c.bf16 %v172_v31, %v171_v30  ;;  %v173_v33 = vld [vmem:[%s551_s3 + $0x60] sm:$0xff]  ;;  %v174_v34 = vld [vmem:[%s551_s3 + $0x68] sm:$0xff]  ;;  %v175_v36 = vld [vmem:[%s551_s3 + $0x70] sm:$0xff] }
   0xa   :  { %359 = vmatprep.subr.bf16.mxu1 %v358_v20  ;;  %v378_v35 = vpack.c.bf16 %v174_v34, %v173_v33  ;;  %v176_v37 = vld [vmem:[%s551_s3 + $0x78] sm:$0xff]  ;;  %v274_v55 = vld [vmem:[%s550_s2 + $0x1] ss:$0 sm:$0xff]  ;;  %v275_v57 = vld [vmem:[%s550_s2 + $0x2] ss:$0 sm:$0xff]  ;;  %s421_s2 = smov [#allocation2]  }
   0xb   :  { %v382_v38 = vpack.c.bf16 %v176_v37, %v175_v36  ;;  %s260_s8 = sshll.u32 %s421_s2, 4  ;;  %s261_s8 = int_to_ptr.vmem [resolvable:$true] %s260_s8 }
   0xc   :  { %309 = vmatmul.mubr.msk.f32.vlgmr.msra.gmra.mrb[0].mxu0 %vm29_vm0, %v19_v7  ;;  %s397_s9 = scalar_lea.vmem %s261_s8, 256  ;;  %p402_p1 = scmp.lt.s32.totalorder %s261_s8, %s261_s8 }
   0xd   :  { %361 = vmatpush3.bf16.msra.mxu1 %v358_v20  ;;  %p398_p0 = scmp.ne.s32.totalorder %s261_s8, %s397_s9  ;;  %p403_p2 = scmp.lt.s32.totalorder %s397_s9, %s397_s9 }
   0xe   :  { %363 = vmatprep.subr.bf16.mxu1 %v362_v23 }
   0xf   :  { %p404_p3 = por %p403_p2, %p402_p1 }
  0x11   :  { %365 = vmatpush3.bf16.msra.mxu1 %v362_v23  ;;  %p405_p4 = pnand %p404_p3, %p398_p0 }
  0x12   :  { %367 = vmatprep.subr.bf16.mxu1 %v366_v26 }
  0x15   :  { %369 = vmatpush3.bf16.msra.mxu1 %v366_v26 }
  0x16   :  { %371 = vmatprep.subr.bf16.mxu1 %v370_v29 }
  0x19   :  { %373 = vmatpush3.bf16.msra.mxu1 %v370_v29 }
  0x1a   :  { %375 = vmatprep.subr.bf16.mxu1 %v374_v32 }
  0x1d   :  { %377 = vmatpush3.bf16.msra.mxu1 %v374_v32 }
  0x1e   :  { %379 = vmatprep.subr.bf16.mxu1 %v378_v35 }
  0x21   :  { %381 = vmatpush3.bf16.msra.mxu1 %v378_v35 }
  0x22   :  { %383 = vmatprep.subr.bf16.mxu1 %v382_v38 }
  0x25   :  { %385 = vmatpush3.bf16.msra.mxu1 %v382_v38 }
  0xdf   :  { %v310_v9 = vpop.f32.mrb[0].mxu0 }
  0xe0   :  { %v102_v10 = vpop.f32.mrb[1].mxu0  ;;  %v472_v12 = vadd.f32 %v310_v9, %v271_v8 }
  0xe1   :  { %v470_v11 = vadd.f32 %v271_v8, %v102_v10 }
  0xe2   :  { %v118_v14 = vmul.f32 %v472_v12, %v472_v12 }
  0xe3   :  { %111 = vadd.xlane.f32.xlu0 %v470_v11  ;;  %v117_v13 = vmul.f32 %v470_v11, %v470_v11 }
  0xe5   :  { %119 = vadd.xlane.f32.xlu1 %v117_v13 }
  0xe7   :  { %113 = vadd.xlane.f32.xlu0 %v472_v12 }
  0xe9   :  { %121 = vadd.xlane.f32.xlu1 %v118_v14 }
 0x170   :  { %v112_v39 = vpop.xlane.xlu0 %111 }
 0x171   :  { %v115_v40 = vmul.f32 0.015625, %v112_v39 }
 0x172   :  { %v120_v41 = vpop.xlane.xlu1 %119 }
 0x173   :  { %v125_v42 = vmul.f32 %v115_v40, %v115_v40  ;;  %v123_v43 = vmul.f32 0.015625, %v120_v41  ;;  %v129_v53 = vsub.f32 %v470_v11, %v115_v40 }
 0x174   :  { %v114_v44 = vpop.xlane.xlu0 %113 }
 0x175   :  { %v127_v45 = vsub.f32 %v123_v43, %v125_v42  ;;  %v116_v46 = vmul.f32 0.015625, %v114_v44 }
 0x176   :  { %v122_v47 = vpop.xlane.xlu1 %121 }
 0x177   :  { %v131_v48 = vadd.f32 1e-05, %v127_v45  ;;  %v126_v49 = vmul.f32 %v116_v46, %v116_v46  ;;  %v124_v50 = vmul.f32 0.015625, %v122_v47  ;;  %v130_v58 = vsub.f32 %v472_v12, %v116_v46 }
 0x179   :  { %389 = vrsqrt.f32 %v131_v48  ;;  %v128_v51 = vsub.f32 %v124_v50, %v126_v49 }
 0x17b   :  { %v132_v52 = vadd.f32 1e-05, %v128_v51 }
 0x17d   :  { %391 = vrsqrt.f32 %v132_v52 }
 0x183   :  { %v390_v54 = vpop.eup %389 }
 0x184   :  { %v135_v56 = vmul.f32 %v390_v54, %v129_v53 }
 0x186   :  { %v143_v59 = vmul.f32 %v274_v55, %v135_v56 }
 0x187   :  { %v392_v60 = vpop.eup %391 }
 0x188   :  { %v136_v61 = vmul.f32 %v392_v60, %v130_v58  ;;  %v149_v62 = vadd.f32 %v275_v57, %v143_v59 }
 0x18a   :  { %v144_v63 = vmul.f32 %v274_v55, %v136_v61  ;;  %v153_v0 = vmul.f32 0.70710677, %v149_v62  ;;  %v151_v4 = vmul.f32 0.5, %v149_v62 }
 0x18c   :  { %v150_v1 = vadd.f32 %v275_v57, %v144_v63  ;;  %393 = verf.f32 %v153_v0 }
 0x18e   :  { %v154_v2 = vmul.f32 0.70710677, %v150_v1  ;;  %v152_v8 = vmul.f32 0.5, %v150_v1 }
 0x190   :  { %395 = verf.f32 %v154_v2 }
 0x196   :  { %v394_v3 = vpop.eup %393 }
 0x197   :  { %v157_v5 = vadd.f32 1.0, %v394_v3 }
 0x199   :  { %v159_v6 = vmul.f32 %v157_v5, %v151_v4 }
 0x19a   :  { %v396_v7 = vpop.eup %395 }
 0x19b   :  { %343 = vmatprep.mubr.f32.mxu1 %v159_v6  ;;  %v158_v9 = vadd.f32 1.0, %v396_v7 }
 0x19d   :  { %v160_v10 = vmul.f32 %v158_v9, %v152_v8 }
 0x19f   :  { %344 = vmatmul.mubr.f32.vlgmr.msra.gmra.mrb[0].mxu1 %v160_v10 }
 0x272   :  { %v345_v11 = vpop.f32.mrb[0].mxu1 }
 0x273   :  { %254 = vst.msk [vmem:[#allocation2 + $0x8] sm:$0xff] %vm252_vm1, %v345_v11  ;;  %v243_v12 = vpop.f32.mrb[1].mxu1 }
 0x274   :  { %253 = vst.msk [vmem:[#allocation2] sm:$0xff] %vm252_vm1, %v243_v12 }
 0x275   :  { %408 = shalt.err (!%p405_p4)
}
 0x276   :  { %s409_s12 = scalar_lea.hbm %s552_s4, 256 }
 0x277   :  { %p410_p5 = scmp.ne.s32.totalorder %s552_s4, %s409_s12  ;;  %p413_p6 = scmp.lt.u32.totalorder %s409_s12, %s552_s4 }
 0x279   :  { %p415_p7 = pnand %p413_p6, %p410_p5 }
 0x27b   :  { %418 = shalt.err (!%p415_p7)
}
 0x27c   :  { %s422_s17 = smov 128   ;;  %s423_s18 = smov 8  }
 0x27d   :  { %266 = dma.vmem_to_hbm [thread:$0]  %s261_s8, 256, %s552_s4, [#allocation3], %s422_s17, %s422_s17, %s423_s18  }
 0x27e   :  { %419 = dma.done.wait [#allocation3], 256  }
 0x27f   :  { %420 = vsyncadd [#allocation3], 4294967040 }
 0x280   :  { %270 = vsyncpa [#allocation3], 1 }

// kernel: tpu_custom_call.1
= control target key start
LH: loop header
LB: loop body
LE: loop exit
PB: predicated region body
PF: predicated region fallthrough
CT: control target
= control target key end

     0   :  { %vm29_vm0 = vcmask 261120   ;;  %s548_s0 = inlined_call_operand.vmem [shape: f32[10,32], index: 0, kind: input, shape index: {}]   ;;  %s549_s1 = inlined_call_operand.vmem [shape: f32[32,128], index: 1, kind: input, shape index: {}]   ;;  %s550_s2 = inlined_call_operand.vmem [shape: f32[3,128], index: 2, kind: input, shape index: {}]   ;;  %s551_s3 = inlined_call_operand.vmem [shape: f32[128,16], index: 3, kind: input, shape index: {}]   ;;  %s552_s4 = inlined_call_operand.hbm [shape: f32[10,16], index: 4, kind: output, shape index: {}]  }
   0x1   :  { %v20_v0 = vld [vmem:[%s549_s1] sm:$0xff]  ;;  %v21_v1 = vld [vmem:[%s549_s1 + $0x8] sm:$0xff]  ;;  %v22_v2 = vld [vmem:[%s549_s1 + $0x10] sm:$0xff] }
   0x2   :  { %v346_v3 = vpack.c.bf16 %v21_v1, %v20_v0  ;;  %v23_v4 = vld [vmem:[%s549_s1 + $0x18] sm:$0xff]  ;;  %v18_v5 = vld [vmem:[%s548_s0] sm:$0xff] }
   0x3   :  { %v350_v6 = vpack.c.bf16 %v23_v4, %v22_v2  ;;  %308 = vmatprep.mubr.msk.f32.mxu0 %vm29_vm0, %v18_v5 }
   0x4   :  { %9 = vsyncpa [#allocation3], 0  ;;  %347 = vmatprep.subr.bf16.mxu0 %v346_v3  ;;  %v19_v7 = vld [vmem:[%s548_s0 + $0x8] sm:$0xff]  ;;  %v271_v8 = vld [vmem:[%s550_s2] ss:$0 sm:$0xff]  ;;  %vm252_vm1 = vcmask 130048  }
   0x5   :  { %349 = vmatpush3.bf16.msra.mxu0 %v346_v3  ;;  %v161_v15 = vld [vmem:[%s551_s3] sm:$0xff]  ;;  %v162_v16 = vld [vmem:[%s551_s3 + $0x8] sm:$0xff]  ;;  %v163_v18 = vld [vmem:[%s551_s3 + $0x10] sm:$0xff] }
   0x6   :  { %351 = vmatprep.subr.bf16.mxu0 %v350_v6  ;;  %v354_v17 = vpack.c.bf16 %v162_v16, %v161_v15  ;;  %v164_v19 = vld [vmem:[%s551_s3 + $0x18] sm:$0xff]  ;;  %v165_v21 = vld [vmem:[%s551_s3 + $0x20] sm:$0xff]  ;;  %v166_v22 = vld [vmem:[%s551_s3 + $0x28] sm:$0xff] }
   0x7   :  { %v358_v20 = vpack.c.bf16 %v164_v19, %v163_v18  ;;  %v362_v23 = vpack.c.bf16 %v166_v22, %v165_v21  ;;  %v167_v24 = vld [vmem:[%s551_s3 + $0x30] sm:$0xff]  ;;  %v168_v25 = vld [vmem:[%s551_s3 + $0x38] sm:$0xff]  ;;  %v169_v27 = vld [vmem:[%s551_s3 + $0x40] sm:$0xff] }
   0x8   :  { %355 = vmatprep.subr.bf16.mxu1 %v354_v17  ;;  %v366_v26 = vpack.c.bf16 %v168_v25, %v167_v24  ;;  %v170_v28 = vld [vmem:[%s551_s3 + $0x48] sm:$0xff]  ;;  %v171_v30 = vld [vmem:[%s551_s3 + $0x50] sm:$0xff]  ;;  %v172_v31 = vld [vmem:[%s551_s3 + $0x58] sm:$0xff] }
   0x9   :  { %353 = vmatpush3.bf16.msra.mxu0 %v350_v6  ;;  %357 = vmatpush3.bf16.msra.mxu1 %v354_v17  ;;  %v370_v29 = vpack.c.bf16 %v170_v28, %v169_v27  ;;  %v374_v32 = vpack.c.bf16 %v172_v31, %v171_v30  ;;  %v173_v33 = vld [vmem:[%s551_s3 + $0x60] sm:$0xff]  ;;  %v174_v34 = vld [vmem:[%s551_s3 + $0x68] sm:$0xff]  ;;  %v175_v36 = vld [vmem:[%s551_s3 + $0x70] sm:$0xff] }
   0xa   :  { %359 = vmatprep.subr.bf16.mxu1 %v358_v20  ;;  %v378_v35 = vpack.c.bf16 %v174_v34, %v173_v33  ;;  %v176_v37 = vld [vmem:[%s551_s3 + $0x78] sm:$0xff]  ;;  %v274_v55 = vld [vmem:[%s550_s2 + $0x1] ss:$0 sm:$0xff]  ;;  %v275_v57 = vld [vmem:[%s550_s2 + $0x2] ss:$0 sm:$0xff]  ;;  %s421_s2 = smov [#allocation2]  }
   0xb   :  { %v382_v38 = vpack.c.bf16 %v176_v37, %v175_v36  ;;  %s260_s8 = sshll.u32 %s421_s2, 4  ;;  %s261_s8 = int_to_ptr.vmem [resolvable:$true] %s260_s8 }
   0xc   :  { %309 = vmatmul.mubr.msk.f32.vlgmr.msra.gmra.mrb[0].mxu0 %vm29_vm0, %v19_v7  ;;  %s397_s9 = scalar_lea.vmem %s261_s8, 256  ;;  %p402_p1 = scmp.lt.s32.totalorder %s261_s8, %s261_s8 }
   0xd   :  { %361 = vmatpush3.bf16.msra.mxu1 %v358_v20  ;;  %p398_p0 = scmp.ne.s32.totalorder %s261_s8, %s397_s9  ;;  %p403_p2 = scmp.lt.s32.totalorder %s397_s9, %s397_s9 }
   0xe   :  { %363 = vmatprep.subr.bf16.mxu1 %v362_v23 }
   0xf   :  { %p404_p3 = por %p403_p2, %p402_p1 }
  0x11   :  { %365 = vmatpush3.bf16.msra.mxu1 %v362_v23  ;;  %p405_p4 = pnand %p404_p3, %p398_p0 }
  0x12   :  { %367 = vmatprep.subr.bf16.mxu1 %v366_v26 }
  0x15   :  { %369 = vmatpush3.bf16.msra.mxu1 %v366_v26 }
  0x16   :  { %371 = vmatprep.subr.bf16.mxu1 %v370_v29 }
  0x19   :  { %373 = vmatpush3.bf16.msra.mxu1 %v370_v29 }
  0x1a   :  { %375 = vmatprep.subr.bf16.mxu1 %v374_v32 }
  0x1d   :  { %377 = vmatpush3.bf16.msra.mxu1 %v374_v32 }
  0x1e   :  { %379 = vmatprep.subr.bf16.mxu1 %v378_v35 }
  0x21   :  { %381 = vmatpush3.bf16.msra.mxu1 %v378_v35 }
  0x22   :  { %383 = vmatprep.subr.bf16.mxu1 %v382_v38 }
  0x25   :  { %385 = vmatpush3.bf16.msra.mxu1 %v382_v38 }
  0xdf   :  { %v310_v9 = vpop.f32.mrb[0].mxu0 }
  0xe0   :  { %v102_v10 = vpop.f32.mrb[1].mxu0  ;;  %v472_v12 = vadd.f32 %v310_v9, %v271_v8 }
  0xe1   :  { %v470_v11 = vadd.f32 %v271_v8, %v102_v10 }
  0xe2   :  { %v118_v14 = vmul.f32 %v472_v12, %v472_v12 }
  0xe3   :  { %111 = vadd.xlane.f32.xlu0 %v470_v11  ;;  %v117_v13 = vmul.f32 %v470_v11, %v470_v11 }
  0xe5   :  { %119 = vadd.xlane.f32.xlu1 %v117_v13 }
  0xe7   :  { %113 = vadd.xlane.f32.xlu0 %v472_v12 }
  0xe9   :  { %121 = vadd.xlane.f32.xlu1 %v118_v14 }
 0x170   :  { %v112_v39 = vpop.xlane.xlu0 %111 }
 0x171   :  { %v115_v40 = vmul.f32 0.015625, %v112_v39 }
 0x172   :  { %v120_v41 = vpop.xlane.xlu1 %119 }
 0x173   :  { %v125_v42 = vmul.f32 %v115_v40, %v115_v40  ;;  %v123_v43 = vmul.f32 0.015625, %v120_v41  ;;  %v129_v53 = vsub.f32 %v470_v11, %v115_v40 }
 0x174   :  { %v114_v44 = vpop.xlane.xlu0 %113 }
 0x175   :  { %v127_v45 = vsub.f32 %v123_v43, %v125_v42  ;;  %v116_v46 = vmul.f32 0.015625, %v114_v44 }
 0x176   :  { %v122_v47 = vpop.xlane.xlu1 %121 }
 0x177   :  { %v131_v48 = vadd.f32 1e-05, %v127_v45  ;;  %v126_v49 = vmul.f32 %v116_v46, %v116_v46  ;;  %v124_v50 = vmul.f32 0.015625, %v122_v47  ;;  %v130_v58 = vsub.f32 %v472_v12, %v116_v46 }
 0x179   :  { %389 = vrsqrt.f32 %v131_v48  ;;  %v128_v51 = vsub.f32 %v124_v50, %v126_v49 }
 0x17b   :  { %v132_v52 = vadd.f32 1e-05, %v128_v51 }
 0x17d   :  { %391 = vrsqrt.f32 %v132_v52 }
 0x183   :  { %v390_v54 = vpop.eup %389 }
 0x184   :  { %v135_v56 = vmul.f32 %v390_v54, %v129_v53 }
 0x186   :  { %v143_v59 = vmul.f32 %v274_v55, %v135_v56 }
 0x187   :  { %v392_v60 = vpop.eup %391 }
 0x188   :  { %v136_v61 = vmul.f32 %v392_v60, %v130_v58  ;;  %v149_v62 = vadd.f32 %v275_v57, %v143_v59 }
 0x18a   :  { %v144_v63 = vmul.f32 %v274_v55, %v136_v61  ;;  %v153_v0 = vmul.f32 0.70710677, %v149_v62  ;;  %v151_v4 = vmul.f32 0.5, %v149_v62 }
 0x18c   :  { %v150_v1 = vadd.f32 %v275_v57, %v144_v63  ;;  %393 = verf.f32 %v153_v0 }
 0x18e   :  { %v154_v2 = vmul.f32 0.70710677, %v150_v1  ;;  %v152_v8 = vmul.f32 0.5, %v150_v1 }
 0x190   :  { %395 = verf.f32 %v154_v2 }
 0x196   :  { %v394_v3 = vpop.eup %393 }
 0x197   :  { %v157_v5 = vadd.f32 1.0, %v394_v3 }
 0x199   :  { %v159_v6 = vmul.f32 %v157_v5, %v151_v4 }
 0x19a   :  { %v396_v7 = vpop.eup %395 }
 0x19b   :  { %343 = vmatprep.mubr.f32.mxu1 %v159_v6  ;;  %v158_v9 = vadd.f32 1.0, %v396_v7 }
 0x19d   :  { %v160_v10 = vmul.f32 %v158_v9, %v152_v8 }
 0x19f   :  { %344 = vmatmul.mubr.f32.vlgmr.msra.gmra.mrb[0].mxu1 %v160_v10 }
 0x272   :  { %v345_v11 = vpop.f32.mrb[0].mxu1 }
 0x273   :  { %254 = vst.msk [vmem:[#allocation2 + $0x8] sm:$0xff] %vm252_vm1, %v345_v11  ;;  %v243_v12 = vpop.f32.mrb[1].mxu1 }
 0x274   :  { %253 = vst.msk [vmem:[#allocation2] sm:$0xff] %vm252_vm1, %v243_v12 }
 0x275   :  { %408 = shalt.err (!%p405_p4)
}
 0x276   :  { %s409_s12 = scalar_lea.hbm %s552_s4, 256 }
 0x277   :  { %p410_p5 = scmp.ne.s32.totalorder %s552_s4, %s409_s12  ;;  %p413_p6 = scmp.lt.u32.totalorder %s409_s12, %s552_s4 }
 0x279   :  { %p415_p7 = pnand %p413_p6, %p410_p5 }
 0x27b   :  { %418 = shalt.err (!%p415_p7)
}
 0x27c   :  { %s422_s17 = smov 128   ;;  %s423_s18 = smov 8  }
 0x27d   :  { %266 = dma.vmem_to_hbm [thread:$0]  %s261_s8, 256, %s552_s4, [#allocation3], %s422_s17, %s422_s17, %s423_s18  }
 0x27e   :  { %419 = dma.done.wait [#allocation3], 256  }
 0x27f   :  { %420 = vsyncadd [#allocation3], 4294967040 }
 0x280   :  { %270 = vsyncpa [#allocation3], 1 }

</bundles_post_ra>
